<compile_context>
chip_gen: v6e
topology: v6e:2x2x1
jax: 0.10.0
libtpu: 0.0.40
codegen_flags: <defaults>
</compile_context>

<pallas_src>
import functools
import math

import jax
import jax.numpy as jnp
from jax import lax
from jax.experimental import pallas as pl
from jax.experimental.pallas import tpu as pltpu


# Leave headroom on v7x (64 MiB physical VMEM / TensorCore); v5e/v6e have 128 MiB.
_VMEM_LIMIT_BYTES = 48 * 1024 * 1024

_SQRT_HALF = 0.7071067811865476


# ---------------------------------------------------------------------------
# helpers
# ---------------------------------------------------------------------------

def _round_up(x, m):
    return ((x + m - 1) // m) * m


def _pad_dim(x, axis, mult):
    """Zero-pad `axis` of x up to a multiple of `mult` (no-op if aligned)."""
    size = x.shape[axis]
    pad = (-size) % mult
    if pad == 0:
        return x
    widths = [(0, 0)] * x.ndim
    widths[axis] = (0, pad)
    return jnp.pad(x, widths)


def _gelu_f32(x):
    # exact (erf) gelu, matching torch.nn.functional.gelu default
    return 0.5 * x * (1.0 + lax.erf(x * _SQRT_HALF))


# ---------------------------------------------------------------------------
# Generic tiled matmul kernel: o = x @ w + b [+ residual]
# ---------------------------------------------------------------------------

def _matmul_kernel(x_ref, w_ref, b_ref, *rest, has_residual):
    if has_residual:
        r_ref, o_ref, acc_ref = rest
    else:
        o_ref, acc_ref = rest

    kk = pl.program_id(2)

    @pl.when(kk == 0)
    def _():
        acc_ref[...] = jnp.zeros_like(acc_ref)

    acc_ref[...] += jnp.dot(x_ref[...], w_ref[...],
                            preferred_element_type=jnp.float32)

    @pl.when(kk == pl.num_programs(2) - 1)
    def _():
        acc = acc_ref[...] + b_ref[...]          # bias applied exactly once
        if has_residual:
            acc = acc + r_ref[...].astype(jnp.float32)
        o_ref[...] = acc.astype(o_ref.dtype)


def matmul(x, w, b=None, *, residual=None, tm=512, tn=512, tk=512,
           out_dtype=None):
    """x: (M, K), w: (K, N) stored (in, out); b: (N,) or None; residual: (M, N)."""
    M, K = x.shape
    N = w.shape[1]
    out_dtype = out_dtype or x.dtype

    tm = min(tm, _round_up(M, 8))
    tn = min(tn, _round_up(N, 128))
    tk = min(tk, _round_up(K, 128))

    xp = _pad_dim(_pad_dim(x, 0, tm), 1, tk)
    wp = _pad_dim(_pad_dim(w, 0, tk), 1, tn)
    Mp, Kp = xp.shape
    Np = wp.shape[1]

    if b is None:
        b = jnp.zeros((N,), jnp.float32)
    bp = _pad_dim(b.astype(jnp.float32).reshape(1, N), 1, tn)

    has_res = residual is not None
    inputs = [xp, wp, bp]
    in_specs = [
        pl.BlockSpec((tm, tk), lambda i, j, k: (i, k)),
        # TODO(synk): on v5e decode shapes, pipeline_mode=pl.Buffered(3) on this
        # weight spec hides more of the streaming-DMA latency.
        pl.BlockSpec((tk, tn), lambda i, j, k: (k, j)),
        pl.BlockSpec((1, tn), lambda i, j, k: (0, j)),
    ]
    if has_res:
        rp = _pad_dim(_pad_dim(residual, 0, tm), 1, tn)
        inputs.append(rp)
        in_specs.append(pl.BlockSpec((tm, tn), lambda i, j, k: (i, j)))

    grid = (Mp // tm, Np // tn, Kp // tk)
    cost = pl.CostEstimate(
        flops=int(2 * M * N * K),
        transcendentals=0,
        bytes_accessed=int(2 * (M * K + K * N + M * N
                                + (M * N if has_res else 0)) + 4 * N))

    out = pl.pallas_call(
        functools.partial(_matmul_kernel, has_residual=has_res),
        out_shape=jax.ShapeDtypeStruct((Mp, Np), out_dtype),
        grid=grid,
        in_specs=in_specs,
        out_specs=pl.BlockSpec((tm, tn), lambda i, j, k: (i, j)),
        scratch_shapes=[pltpu.VMEM((tm, tn), jnp.float32)],
        compiler_params=pltpu.CompilerParams(
            dimension_semantics=("parallel", "parallel", "arbitrary"),
            vmem_limit_bytes=_VMEM_LIMIT_BYTES),
        cost_estimate=cost,
    )(*inputs)

    if (Mp, Np) != (M, N):
        out = out[:M, :N]
    return out


# ---------------------------------------------------------------------------
# Fused LayerNorm + [Wqkv | fc1(+gelu)] kernel with two outputs
# ---------------------------------------------------------------------------

def _ln_qkv_fc1_kernel(x_ref, g_ref, bln_ref, w1_ref, b1_ref, w2_ref,
                       qkv_ref, fc1_ref, ln_scr, *, j_split, eps):
    j = pl.program_id(1)

    @pl.when(j == 0)
    def _():
        x = x_ref[...].astype(jnp.float32)
        mean = jnp.mean(x, axis=-1, keepdims=True)
        xc = x - mean
        var = jnp.mean(xc * xc, axis=-1, keepdims=True)   # biased, like torch LN
        y = xc * lax.rsqrt(var + eps)
        ln_scr[...] = (y * g_ref[...] + bln_ref[...]).astype(ln_scr.dtype)

    ln = ln_scr[...]

    @pl.when(j < j_split)
    def _():
        acc = jnp.dot(ln, w1_ref[...], preferred_element_type=jnp.float32)
        qkv_ref[...] = (acc + b1_ref[...]).astype(qkv_ref.dtype)

    @pl.when(j >= j_split)
    def _():
        acc = jnp.dot(ln, w2_ref[...], preferred_element_type=jnp.float32)
        fc1_ref[...] = _gelu_f32(acc).astype(fc1_ref.dtype)   # gelu applied once


def ln_qkv_fc1(x, gamma, beta, w_qkv, b_qkv, w_fc1, eps, *, tm=512, tn=512):
    """Fused LayerNorm + QKV/FC1 projection.  x: (M, e).
    Returns (qkv (M, 3e), gelu(fc1(ln(x))) (M, inner))."""
    M, E = x.shape
    N1 = w_qkv.shape[1]
    N2 = w_fc1.shape[1]

    tm = min(tm, _round_up(M, 8))
    tn = min(tn, max(_round_up(N1, 128), _round_up(N2, 128)))

    xp = _pad_dim(x, 0, tm)
    Mp = xp.shape[0]
    w1p = _pad_dim(w_qkv, 1, tn)
    w2p = _pad_dim(w_fc1, 1, tn)
    b1p = _pad_dim(b_qkv.astype(jnp.float32).reshape(1, N1), 1, tn)
    N1p, N2p = w1p.shape[1], w2p.shape[1]
    j1, j2 = N1p // tn, N2p // tn

    g2 = gamma.astype(jnp.float32).reshape(1, E)
    bt2 = beta.astype(jnp.float32).reshape(1, E)

    grid = (Mp // tm, j1 + j2)
    cost = pl.CostEstimate(
        flops=int(2 * M * E * (N1 + N2)),
        transcendentals=int(M * N2),
        bytes_accessed=int(2 * (M * E + E * (N1 + N2) + M * (N1 + N2))))

    qkv, fc1 = pl.pallas_call(
        functools.partial(_ln_qkv_fc1_kernel, j_split=j1, eps=eps),
        out_shape=(jax.ShapeDtypeStruct((Mp, N1p), x.dtype),
                   jax.ShapeDtypeStruct((Mp, N2p), x.dtype)),
        grid=grid,
        in_specs=[
            pl.BlockSpec((tm, E), lambda i, j: (i, 0)),
            pl.BlockSpec((1, E), lambda i, j: (0, 0)),
            pl.BlockSpec((1, E), lambda i, j: (0, 0)),
            pl.BlockSpec((E, tn), lambda i, j: (0, jnp.minimum(j, j1 - 1))),
            pl.BlockSpec((1, tn), lambda i, j: (0, jnp.minimum(j, j1 - 1))),
            pl.BlockSpec((E, tn), lambda i, j: (0, jnp.maximum(j - j1, 0))),
        ],
        out_specs=(
            pl.BlockSpec((tm, tn), lambda i, j: (i, jnp.minimum(j, j1 - 1))),
            pl.BlockSpec((tm, tn), lambda i, j: (i, jnp.maximum(j - j1, 0))),
        ),
        scratch_shapes=[pltpu.VMEM((tm, E), x.dtype)],
        compiler_params=pltpu.CompilerParams(
            dimension_semantics=("parallel", "arbitrary"),
            vmem_limit_bytes=_VMEM_LIMIT_BYTES),
        cost_estimate=cost,
    )(xp, g2, bt2, w1p, b1p, w2p)

    if (Mp, N1p) != (M, N1):
        qkv = qkv[:M, :N1]
    if (Mp, N2p) != (M, N2):
        fc1 = fc1[:M, :N2]
    return qkv, fc1


# ---------------------------------------------------------------------------
# Flash attention: grid (b, head-blocks, q-tiles, kv-tiles), online softmax
# ---------------------------------------------------------------------------

def _flash_attn_kernel(q_ref, k_ref, v_ref, o_ref, m_ref, l_ref, acc_ref, *,
                       scale, causal, kv_len, q_blk, kv_blk, mask_kv):
    q_i = pl.program_id(2)
    kv_i = pl.program_id(3)

    @pl.when(kv_i == 0)
    def _():
        m_ref[...] = jnp.full_like(m_ref, -jnp.inf)
        l_ref[...] = jnp.zeros_like(l_ref)
        acc_ref[...] = jnp.zeros_like(acc_ref)

    def update(s):
        m_prev = m_ref[...]
        m_new = jnp.maximum(m_prev, jnp.max(s, axis=-1, keepdims=True))
        alpha = jnp.exp(m_prev - m_new)
        p = jnp.exp(s - m_new)
        l_ref[...] = alpha * l_ref[...] + jnp.sum(p, axis=-1, keepdims=True)
        acc_ref[...] = alpha * acc_ref[...] + jnp.einsum(
            "hqk,khd->hqd", p.astype(v_ref.dtype), v_ref[0],
            preferred_element_type=jnp.float32)
        m_ref[...] = m_new

    def compute():
        # q/k blocks are (tq, hb, d) / (tk, hb, d): batched matmul over heads.
        s = jnp.einsum("qhd,khd->hqk", q_ref[0], k_ref[0],
                       preferred_element_type=jnp.float32) * scale
        if mask_kv:
            cols = kv_i * kv_blk + lax.broadcasted_iota(jnp.int32, s.shape, 2)
            s = jnp.where(cols < kv_len, s, -1e30)
        if causal:
            # Only diagonal-crossing tiles pay for the iota / where mask math.
            needs_mask = (kv_i * kv_blk + kv_blk - 1) > (q_i * q_blk)

            @pl.when(needs_mask)
            def _():
                rows = q_i * q_blk + lax.broadcasted_iota(jnp.int32, s.shape, 1)
                cols = kv_i * kv_blk + lax.broadcasted_iota(jnp.int32, s.shape, 2)
                # torch: triu(full(-10000), diagonal=1) additive mask
                update(s + jnp.where(cols > rows, -10000.0, 0.0))

            @pl.when(jnp.logical_not(needs_mask))
            def _():
                update(s)
        else:
            update(s)

    if causal:
        # Tiles entirely above the diagonal are fully masked: skip all work.
        @pl.when(kv_i * kv_blk <= q_i * q_blk + q_blk - 1)
        def _():
            compute()
    else:
        compute()

    @pl.when(kv_i == pl.num_programs(3) - 1)
    def _():
        inv_l = pl.reciprocal(l_ref[...], approx=True)     # EUP slot
        o_ref[0] = (acc_ref[...] * inv_l).astype(o_ref.dtype)


def flash_attention(q, k, v, scale, causal, *, tq=128, tk=128):
    """q: (b, Sq, h, d), k/v: (b, Sk, h, d) -> (b, h, Sq, d)."""
    b, Sq, h, d = q.shape
    Sk = k.shape[1]

    tq = min(tq, _round_up(Sq, 8))
    tk = min(tk, _round_up(Sk, 8))
    hb = h if (h <= 8 or h % 8 != 0) else 8       # heads per grid block

    qp = _pad_dim(q, 1, tq)
    kp = _pad_dim(k, 1, tk)
    vp = _pad_dim(v, 1, tk)
    Sqp, Skp = qp.shape[1], kp.shape[1]

    grid = (b, h // hb, Sqp // tq, Skp // tk)
    cost = pl.CostEstimate(
        flops=int(4 * b * h * Sq * Sk * d),
        transcendentals=int(b * h * Sq * Sk),
        bytes_accessed=int(2 * (2 * b * Sq * h * d + 2 * b * Sk * h * d)))

    out = pl.pallas_call(
        functools.partial(_flash_attn_kernel, scale=scale, causal=causal,
                          kv_len=Sk, q_blk=tq, kv_blk=tk,
                          mask_kv=(Skp != Sk)),
        out_shape=jax.ShapeDtypeStruct((b, h, Sqp, d), q.dtype),
        grid=grid,
        in_specs=[
            pl.BlockSpec((1, tq, hb, d), lambda bi, hi, qi, ki: (bi, qi, hi, 0)),
            pl.BlockSpec((1, tk, hb, d), lambda bi, hi, qi, ki: (bi, ki, hi, 0)),
            pl.BlockSpec((1, tk, hb, d), lambda bi, hi, qi, ki: (bi, ki, hi, 0)),
        ],
        out_specs=pl.BlockSpec((1, hb, tq, d),
                               lambda bi, hi, qi, ki: (bi, hi, qi, 0)),
        scratch_shapes=[
            pltpu.VMEM((hb, tq, 1), jnp.float32),   # running max m
            pltpu.VMEM((hb, tq, 1), jnp.float32),   # running denom l
            pltpu.VMEM((hb, tq, d), jnp.float32),   # output accumulator
        ],
        compiler_params=pltpu.CompilerParams(
            dimension_semantics=("parallel", "parallel", "parallel",
                                 "arbitrary"),
            vmem_limit_bytes=_VMEM_LIMIT_BYTES),
        cost_estimate=cost,
    )(qp, kp, vp)
    return out[:, :, :Sq] if Sqp != Sq else out


# ---------------------------------------------------------------------------
# JAX glue: rotary embedding, block / model wiring
# ---------------------------------------------------------------------------

def apply_rotary_emb_qkv(qkv, cos, sin, seqlen_offset):
    # qkv: (b, s, 3, h, head_dim); cos/sin: (n_positions, rotary_dim // 2)
    b, s, three, h, hd = qkv.shape
    assert three == 3
    rot = cos.shape[1] * 2
    dt = qkv.dtype
    qkv_f = qkv.astype(jnp.float32)
    q, k, v = qkv_f[:, :, 0], qkv_f[:, :, 1], qkv_f[:, :, 2]
    c = cos[seqlen_offset:seqlen_offset + s][:, None, :]   # (s, 1, rot/2)
    si = sin[seqlen_offset:seqlen_offset + s][:, None, :]

    def rotate(x):
        x_rot, x_pass = x[..., :rot], x[..., rot:]
        x1, x2 = jnp.split(x_rot, 2, axis=-1)
        xr = jnp.concatenate([x1 * c - x2 * si, x1 * si + x2 * c], axis=-1)
        return jnp.concatenate([xr, x_pass], axis=-1)

    return rotate(q).astype(dt), rotate(k).astype(dt), v.astype(dt)


def phi_block_forward(p, hidden2d, b, s, cos, sin, cfg, causal, past_kv):
    e = cfg["n_embd"]
    h = cfg["n_head"]
    d = e // h
    scale = 1.0 / math.sqrt(d)

    # Fused LayerNorm + QKV + fc1(+gelu): two outputs, no ln_out HBM round-trip.
    qkv_flat, fc1_act = ln_qkv_fc1(hidden2d, p["ln_g"], p["ln_b"],
                                   p["wqkv"], p["bqkv"], p["wfc1"],
                                   cfg["layer_norm_epsilon"])
    qkv = qkv_flat.reshape(b, s, 3, h, d)

    offset = 0 if past_kv is None else past_kv[0].shape[1]
    q, k, v = apply_rotary_emb_qkv(qkv, cos, sin, offset)     # (b, s, h, d)
    if past_kv is not None:
        k = jnp.concatenate([past_kv[0], k], axis=1)
        v = jnp.concatenate([past_kv[1], v], axis=1)
    new_kv = (k, v)

    # Attention consumes the (b, s, h, d) layout directly (no q/k/v transposes).
    ao = flash_attention(q, k, v, scale, causal)              # (b, h, s, d)
    # TODO(synk): fold the head dim into the kernel's output store (lane-dense
    # (s, h*d) tiles) to remove this last transpose and the masked d-wide vst.
    ao2d = ao.transpose(0, 2, 1, 3).reshape(b * s, e)

    # attn_out + residual fused into out_proj epilogue
    attn_plus_res = matmul(ao2d, p["wout"], p["bout"], residual=hidden2d)
    # fc2(gelu(fc1)) + (attn_out + residual) fused into fc2 epilogue
    out = matmul(fc1_act, p["wfc2"], None, residual=attn_plus_res)
    return out, new_kv


def phi_model_forward(params, cfg, input_ids, past_key_values=None,
                      attention_mask=None):
    """Matches PhiModel.forward: returns (hidden_states, past_key_values)."""
    hidden = params["wte"][input_ids]                         # (b, s, e) bf16
    b, s, e = hidden.shape
    mask = None if s <= 1 else attention_mask
    causal = mask is not None          # padding contents unused, like torch ref
    if past_key_values is None:
        past_key_values = [None] * cfg["n_layer"]

    hidden2d = hidden.reshape(b * s, e)
    new_past = []
    for idx, lp in enumerate(params["layers"]):
        hidden2d, kv = phi_block_forward(lp, hidden2d, b, s, params["cos"],
                                         params["sin"], cfg, causal,
                                         past_key_values[idx])
        new_past.append(kv)
    return hidden2d.reshape(b, s, e), new_past


# ---------------------------------------------------------------------------
# Deterministic synthetic parameters (weights bf16, norms/biases f32)
# ---------------------------------------------------------------------------

def init_params(key, cfg):
    e = cfg["n_embd"]
    inner = cfg["n_inner"]
    vocab = cfg["vocab_size"]
    rot = cfg["rotary_dim"]
    wdt = jnp.bfloat16

    def nrm(k, shape, dtype=wdt, scale=0.02):
        return (scale * jax.random.normal(k, shape, jnp.float32)).astype(dtype)

    keys = iter(jax.random.split(key, 1 + 8 * cfg["n_layer"]))
    params = {"wte": nrm(next(keys), (vocab, e))}

    layers = []
    for _ in range(cfg["n_layer"]):
        layers.append({
            "ln_g": 1.0 + nrm(next(keys), (e,), jnp.float32),
            "ln_b": nrm(next(keys), (e,), jnp.float32),
            "wqkv": nrm(next(keys), (e, 3 * e)),           # stored (in, out)
            "bqkv": nrm(next(keys), (3 * e,), jnp.float32),
            "wfc1": nrm(next(keys), (e, inner)),           # FastLinear bias=False
            "wout": nrm(next(keys), (e, e)),
            "bout": nrm(next(keys), (e,), jnp.float32),
            "wfc2": nrm(next(keys), (inner, e)),
        })
    params["layers"] = layers

    # rotary tables (matches RotaryEmbedding.__init__)
    inv_freq = 1.0 / (10000.0 ** (jnp.arange(0, rot, 2, dtype=jnp.float32) / rot))
    t = jnp.arange(cfg["n_positions"], dtype=jnp.float32)
    freqs = t[:, None] * inv_freq[None, :]
    params["cos"] = jnp.cos(freqs)
    params["sin"] = jnp.sin(freqs)
    return params


# ---------------------------------------------------------------------------

if __name__ == "__main__":
    cfg = {
        "n_embd": 32,
        "n_head": 4,
        "n_inner": 64,
        "n_layer": 2,
        "rotary_dim": 4,
        "n_positions": 64,
        "vocab_size": 128,
        "layer_norm_epsilon": 1e-5,
    }

    key = jax.random.PRNGKey(0)
    k_params, k_ids = jax.random.split(key)
    params = init_params(k_params, cfg)

    batch, seq = 2, 8
    input_ids = jax.random.randint(k_ids, (batch, seq), 0, cfg["vocab_size"])
    attention_mask = jnp.ones((batch, seq), dtype=jnp.int32)  # non-None -> causal

    hidden, past_kv = phi_model_forward(params, cfg, input_ids,
                                        attention_mask=attention_mask)
    jax.block_until_ready(hidden)
    assert hidden.shape == (batch, seq, cfg["n_embd"])
    assert len(past_kv) == cfg["n_layer"]
    assert past_kv[0][0].shape == (batch, seq, cfg["n_head"],
                                   cfg["n_embd"] // cfg["n_head"])
    print("KERNEL_OK")
</pallas_src>

<mosaic_0001>
module attributes {stable_mosaic.version = 11 : i64} {
  func.func @_ln_qkv_fc1_kernel(%arg0: i32, %arg1: i32, %arg2: memref<16x32xbf16, #tpu.memory_space<vmem>>, %arg3: memref<1x32xf32, #tpu.memory_space<vmem>>, %arg4: memref<1x32xf32, #tpu.memory_space<vmem>>, %arg5: memref<32x128xbf16, #tpu.memory_space<vmem>>, %arg6: memref<1x128xf32, #tpu.memory_space<vmem>>, %arg7: memref<32x128xbf16, #tpu.memory_space<vmem>>, %arg8: memref<16x128xbf16, #tpu.memory_space<vmem>>, %arg9: memref<16x128xbf16, #tpu.memory_space<vmem>>, %arg10: memref<16x32xbf16, #tpu.memory_space<vmem>>) attributes {dimension_semantics = [#tpu.dimension_semantics<parallel>, #tpu.dimension_semantics<arbitrary>], iteration_bounds = array<i64: 1, 2>, scalar_prefetch = 0 : i64, scratch_operands = 1 : i64, tpu.core_type = #tpu.core_type<tc>, window_params = [{transform_indices = @transform_0, window_bounds = array<i64: 16, 32>}, {pipeline_mode = #tpu.pipeline_mode<synchronous>, transform_indices = @transform_1, window_bounds = array<i64: 1, 32>}, {pipeline_mode = #tpu.pipeline_mode<synchronous>, transform_indices = @transform_2, window_bounds = array<i64: 1, 32>}, {transform_indices = @transform_3, window_bounds = array<i64: 32, 128>}, {transform_indices = @transform_4, window_bounds = array<i64: 1, 128>}, {transform_indices = @transform_5, window_bounds = array<i64: 32, 128>}, {transform_indices = @transform_6, window_bounds = array<i64: 16, 128>}, {transform_indices = @transform_7, window_bounds = array<i64: 16, 128>}]} {
    %c0_i32 = arith.constant 0 : i32
    %0 = arith.cmpi eq, %arg1, %c0_i32 : i32
    %1 = arith.extui %0 : i1 to i32
    %c0_i32_0 = arith.constant 0 : i32
    %2 = arith.cmpi ne, %1, %c0_i32_0 : i32
    scf.if %2 {
      %c0_5 = arith.constant 0 : index
      %c0_6 = arith.constant 0 : index
      %10 = vector.load %arg2[%c0_5, %c0_6] : memref<16x32xbf16, #tpu.memory_space<vmem>>, vector<16x32xbf16>
      %11 = arith.extf %10 : vector<16x32xbf16> to vector<16x32xf32>
      %cst = arith.constant dense<0.000000e+00> : vector<16xf32>
      %12 = vector.multi_reduction <add>, %11, %cst [1] : vector<16x32xf32> to vector<16xf32>
      %13 = vector.shape_cast %12 : vector<16xf32> to vector<16x1xf32>
      %cst_7 = arith.constant 3.200000e+01 : f32
      %14 = vector.broadcast %cst_7 : f32 to vector<16x1xf32>
      %15 = arith.divf %13, %14 : vector<16x1xf32>
      %16 = vector.broadcast %15 : vector<16x1xf32> to vector<16x32xf32>
      %17 = arith.subf %11, %16 : vector<16x32xf32>
      %18 = arith.mulf %17, %17 : vector<16x32xf32>
      %cst_8 = arith.constant dense<0.000000e+00> : vector<16xf32>
      %19 = vector.multi_reduction <add>, %18, %cst_8 [1] : vector<16x32xf32> to vector<16xf32>
      %20 = vector.shape_cast %19 : vector<16xf32> to vector<16x1xf32>
      %cst_9 = arith.constant 3.200000e+01 : f32
      %21 = vector.broadcast %cst_9 : f32 to vector<16x1xf32>
      %22 = arith.divf %20, %21 : vector<16x1xf32>
      %cst_10 = arith.constant 9.99999974E-6 : f32
      %23 = vector.broadcast %cst_10 : f32 to vector<16x1xf32>
      %24 = arith.addf %22, %23 : vector<16x1xf32>
      %25 = math.rsqrt %24 : vector<16x1xf32>
      %26 = vector.broadcast %25 : vector<16x1xf32> to vector<16x32xf32>
      %27 = arith.mulf %17, %26 : vector<16x32xf32>
      %c0_11 = arith.constant 0 : index
      %c0_12 = arith.constant 0 : index
      %28 = vector.load %arg3[%c0_11, %c0_12] : memref<1x32xf32, #tpu.memory_space<vmem>>, vector<1x32xf32>
      %29 = vector.broadcast %28 : vector<1x32xf32> to vector<16x32xf32>
      %30 = arith.mulf %27, %29 : vector<16x32xf32>
      %c0_13 = arith.constant 0 : index
      %c0_14 = arith.constant 0 : index
      %31 = vector.load %arg4[%c0_13, %c0_14] : memref<1x32xf32, #tpu.memory_space<vmem>>, vector<1x32xf32>
      %32 = vector.broadcast %31 : vector<1x32xf32> to vector<16x32xf32>
      %33 = arith.addf %30, %32 : vector<16x32xf32>
      %34 = arith.truncf %33 : vector<16x32xf32> to vector<16x32xbf16>
      %c0_15 = arith.constant 0 : index
      %c0_16 = arith.constant 0 : index
      %35 = vector.load %arg10[%c0_15, %c0_16] : memref<16x32xbf16, #tpu.memory_space<vmem>>, vector<16x32xbf16>
      tpu.vector_store %arg10[%c0_15, %c0_16], %34 {strides = array<i32>} : memref<16x32xbf16, #tpu.memory_space<vmem>>, vector<16x32xbf16>,
    } else {
    }
    %c0 = arith.constant 0 : index
    %c0_1 = arith.constant 0 : index
    %3 = vector.load %arg10[%c0, %c0_1] : memref<16x32xbf16, #tpu.memory_space<vmem>>, vector<16x32xbf16>
    %c1_i32 = arith.constant 1 : i32
    %4 = arith.cmpi slt, %arg1, %c1_i32 : i32
    %5 = arith.extui %4 : i1 to i32
    %c0_i32_2 = arith.constant 0 : i32
    %6 = arith.cmpi ne, %5, %c0_i32_2 : i32
    scf.if %6 {
      %c0_5 = arith.constant 0 : index
      %c0_6 = arith.constant 0 : index
      %10 = vector.load %arg5[%c0_5, %c0_6] : memref<32x128xbf16, #tpu.memory_space<vmem>>, vector<32x128xbf16>
      %cst = arith.constant dense<0.000000e+00> : vector<16x128xf32>
      %11 = tpu.matmul %3, %10, %cst {dimension_numbers = #tpu.dot_dimension_numbers<[1], [0], [0], [1], [0, 0, 1, 1], [], []>} : vector<16x32xbf16>, vector<32x128xbf16>, vector<16x128xf32> -> vector<16x128xf32>
      %c0_7 = arith.constant 0 : index
      %c0_8 = arith.constant 0 : index
      %12 = vector.load %arg6[%c0_7, %c0_8] : memref<1x128xf32, #tpu.memory_space<vmem>>, vector<1x128xf32>
      %13 = vector.broadcast %12 : vector<1x128xf32> to vector<16x128xf32>
      %14 = arith.addf %11, %13 : vector<16x128xf32>
      %15 = arith.truncf %14 : vector<16x128xf32> to vector<16x128xbf16>
      %c0_9 = arith.constant 0 : index
      %c0_10 = arith.constant 0 : index
      %16 = vector.load %arg8[%c0_9, %c0_10] : memref<16x128xbf16, #tpu.memory_space<vmem>>, vector<16x128xbf16>
      tpu.vector_store %arg8[%c0_9, %c0_10], %15 {strides = array<i32>} : memref<16x128xbf16, #tpu.memory_space<vmem>>, vector<16x128xbf16>,
    } else {
    }
    %c1_i32_3 = arith.constant 1 : i32
    %7 = arith.cmpi sge, %arg1, %c1_i32_3 : i32
    %8 = arith.extui %7 : i1 to i32
    %c0_i32_4 = arith.constant 0 : i32
    %9 = arith.cmpi ne, %8, %c0_i32_4 : i32
    scf.if %9 {
      %c0_5 = arith.constant 0 : index
      %c0_6 = arith.constant 0 : index
      %10 = vector.load %arg7[%c0_5, %c0_6] : memref<32x128xbf16, #tpu.memory_space<vmem>>, vector<32x128xbf16>
      %cst = arith.constant dense<0.000000e+00> : vector<16x128xf32>
      %11 = tpu.matmul %3, %10, %cst {dimension_numbers = #tpu.dot_dimension_numbers<[1], [0], [0], [1], [0, 0, 1, 1], [], []>} : vector<16x32xbf16>, vector<32x128xbf16>, vector<16x128xf32> -> vector<16x128xf32>
      %cst_7 = arith.constant 5.000000e-01 : f32
      %12 = vector.broadcast %cst_7 : f32 to vector<16x128xf32>
      %13 = arith.mulf %12, %11 : vector<16x128xf32>
      %cst_8 = arith.constant 0.707106769 : f32
      %14 = vector.broadcast %cst_8 : f32 to vector<16x128xf32>
      %15 = arith.mulf %11, %14 : vector<16x128xf32>
      %16 = math.erf %15 : vector<16x128xf32>
      %cst_9 = arith.constant 1.000000e+00 : f32
      %17 = vector.broadcast %cst_9 : f32 to vector<16x128xf32>
      %18 = arith.addf %17, %16 : vector<16x128xf32>
      %19 = arith.mulf %13, %18 : vector<16x128xf32>
      %20 = arith.truncf %19 : vector<16x128xf32> to vector<16x128xbf16>
      %c0_10 = arith.constant 0 : index
      %c0_11 = arith.constant 0 : index
      %21 = vector.load %arg9[%c0_10, %c0_11] : memref<16x128xbf16, #tpu.memory_space<vmem>>, vector<16x128xbf16>
      tpu.vector_store %arg9[%c0_10, %c0_11], %20 {strides = array<i32>} : memref<16x128xbf16, #tpu.memory_space<vmem>>, vector<16x128xbf16>,
    } else {
    }
    return
  }
  func.func @transform_0(%arg0: i32, %arg1: i32) -> (i32, i32) {
    %c0_i32 = arith.constant 0 : i32
    %c0_i32_0 = arith.constant 0 : i32
    return %arg0, %c0_i32 : i32, i32
  }
  func.func @transform_1(%arg0: i32, %arg1: i32) -> (i32, i32) {
    %c0_i32 = arith.constant 0 : i32
    %c0_i32_0 = arith.constant 0 : i32
    %c0_i32_1 = arith.constant 0 : i32
    return %c0_i32, %c0_i32_0 : i32, i32
  }
  func.func @transform_2(%arg0: i32, %arg1: i32) -> (i32, i32) {
    %c0_i32 = arith.constant 0 : i32
    %c0_i32_0 = arith.constant 0 : i32
    %c0_i32_1 = arith.constant 0 : i32
    return %c0_i32, %c0_i32_0 : i32, i32
  }
  func.func @transform_3(%arg0: i32, %arg1: i32) -> (i32, i32) {
    %c0_i32 = arith.constant 0 : i32
    %0 = arith.minsi %arg1, %c0_i32 : i32
    %c0_i32_0 = arith.constant 0 : i32
    %c0_i32_1 = arith.constant 0 : i32
    return %c0_i32_0, %0 : i32, i32
  }
  func.func @transform_4(%arg0: i32, %arg1: i32) -> (i32, i32) {
    %c0_i32 = arith.constant 0 : i32
    %0 = arith.minsi %arg1, %c0_i32 : i32
    %c0_i32_0 = arith.constant 0 : i32
    %c0_i32_1 = arith.constant 0 : i32
    return %c0_i32_0, %0 : i32, i32
  }
  func.func @transform_5(%arg0: i32, %arg1: i32) -> (i32, i32) {
    %c1_i32 = arith.constant 1 : i32
    %0 = arith.subi %arg1, %c1_i32 : i32
    %c0_i32 = arith.constant 0 : i32
    %1 = arith.maxsi %0, %c0_i32 : i32
    %c0_i32_0 = arith.constant 0 : i32
    %c0_i32_1 = arith.constant 0 : i32
    return %c0_i32_0, %1 : i32, i32
  }
  func.func @transform_6(%arg0: i32, %arg1: i32) -> (i32, i32) {
    %c0_i32 = arith.constant 0 : i32
    %0 = arith.minsi %arg1, %c0_i32 : i32
    %c0_i32_0 = arith.constant 0 : i32
    return %arg0, %0 : i32, i32
  }
  func.func @transform_7(%arg0: i32, %arg1: i32) -> (i32, i32) {
    %c1_i32 = arith.constant 1 : i32
    %0 = arith.subi %arg1, %c1_i32 : i32
    %c0_i32 = arith.constant 0 : i32
    %1 = arith.maxsi %0, %c0_i32 : i32
    %c0_i32_0 = arith.constant 0 : i32
    return %arg0, %1 : i32, i32
  }
}

</mosaic_0001>

<bundles_post_ra>
// kernel: tpu_custom_call.1
= control target key start
LH: loop header
LB: loop body
LE: loop exit
PB: predicated region body
PF: predicated region fallthrough
CT: control target
= control target key end

     0   :  { %s1696_s0 = inlined_call_operand.hbm [shape: bf16[16,32], index: 0, kind: input, shape index: {}]   ;;  %s1697_s1 = inlined_call_operand.vmem [shape: f32[1,32], index: 1, kind: input, shape index: {}]   ;;  %s1698_s2 = inlined_call_operand.vmem [shape: f32[1,32], index: 2, kind: input, shape index: {}]   ;;  %s1699_s3 = inlined_call_operand.hbm [shape: bf16[32,128], index: 3, kind: input, shape index: {}]   ;;  %s1700_s4 = inlined_call_operand.vmem [shape: f32[1,128], index: 4, kind: input, shape index: {}]   ;;  %s1701_s5 = inlined_call_operand.hbm [shape: bf16[32,128], index: 5, kind: input, shape index: {}]   ;;  %s1702_s6 = inlined_call_operand.hbm [shape: bf16[16,128], index: 6, kind: output, shape index: {0}]   ;;  %s1703_s7 = inlined_call_operand.hbm [shape: bf16[16,128], index: 7, kind: output, shape index: {1}]  }
   0x1   :  { %1713 = sst [smem:[#allocation18_spill]] %s1696_s0 }
   0x2   :  { %1714 = sst [smem:[#allocation19_spill]] %s1697_s1 }
   0x3   :  { %1715 = sst [smem:[#allocation20_spill]] %s1699_s3 }
   0x4   :  { %13 = vsyncpa [#allocation4], 0 }
   0x5   :  { %14 = vsyncpa [#allocation7], 0 }
   0x6   :  { %16 = vsyncpa [#allocation7 + $0x1], 0 }
   0x7   :  { %17 = vsyncpa [#allocation5], 0 }
   0x8   :  { %19 = vsyncpa [#allocation5 + $0x1], 0 }
   0x9   :  { %20 = vsyncpa [#allocation11], 0 }
   0xa   :  { %22 = vsyncpa [#allocation11 + $0x1], 0  ;;  %s1387_s24 = smov 0   ;;  %s1389_s25 = smov 0  }
   0xb   :  { %s1391_s26 = smov 0   ;;  %s1393_s27 = smov 0  }
   0xc   :  { %s1395_s28 = smov 0   ;;  %s1397_s29 = smov 0  }
   0xd   :  { %s1399_s30 = smov 0  }
   0xe LB: > { %s37_s8 = sadd.s32 1, %s1328_s29  ;;  %p1706_p1 = scmp.ne.s32.totalorder %s1320_s27, 0  ;;  %s1332_s30 = sphi %s1399_s30, %s28_s30   ;;  %s1328_s29 = sphi %s1397_s29, %s1747_s29   ;;  %s1324_s28 = sphi %s1395_s28, %s1746_s28   ;;  %s1320_s27 = sphi %s1393_s27, %s1686_s27   ;;  %s1316_s26 = sphi %s1391_s26, %s1745_s26   ;;  %s1312_s25 = sphi %s1389_s25, %s1681_s25   ;;  %s1308_s24 = sphi %s1387_s24, %s1744_s24  }
   0xf   : > { %p38_p0 = scmp.ge.s32.totalorder %s37_s8, 2  ;;  %p1705_p2 = scmp.eq.s32.totalorder %s1332_s30, 0 }
  0x10   : > { %p1704_p5 = scmp.lt.s32.totalorder %s1332_s30, 2  ;;  %s306_s9 = sand.u32 1, %s1332_s30  }
  0x11   : > { %s1749_s8 = smov (%p38_p0, %s37_s8), 0  ;;  %p128_p3 = por %p1706_p1, %p1705_p2 }
  0x12   : > { %1716 = sst [smem:[#allocation17_spill]] %s1749_s8  ;;  %s1334_s11 = smov [#allocation6]  }
  0x13   : > { %p1436_p6 = pnand %p1704_p5, %p128_p3  ;;  %s318_s12 = sshll.u32 %s1334_s11, 4  ;;  %s319_s12 = int_to_ptr.vmem [resolvable:$true] %s318_s12 }
  0x14   : > { %s1440_s13 = scalar_lea.sflag [#allocation7], %s306_s9  ;;  %s1718_s3 = sld [smem:[#allocation20_spill]] }
  0x15   : > { %p1116_p8 = pneg %p1436_p6 }
  0x1a   : > { %s1114_s16 = scalar_lea.hbm %s1718_s3, 256 }
  0x1b   : > { %p1115_p7 = scmp.ne.s32.totalorder %s1718_s3, %s1114_s16  ;;  %p1121_p11 = scmp.lt.s32.totalorder %s1114_s16, %s1114_s16 }
  0x1d   : > { %p1117_p9 = pnand %p1116_p8, %p1115_p7 }
  0x1f   : > { %p1118_p10 = pneg %p1117_p9 }
  0x21   : > { %p1123_p12 = pnand %p1121_p11, %p1118_p10 }
  0x23   : > { %1126 = shalt.err (!%p1123_p12)
}
  0x24   : > { %s1127_s19 = scalar_lea.vmem %s319_s12, 256  ;;  %s1134_s20 = scalar_lea.vmem %s319_s12, 512 }
  0x25   : > { %p1128_p13 = scmp.ne.s32.totalorder %s319_s12, %s1127_s19  ;;  %p1135_p4 = scmp.lt.s32.totalorder %s319_s12, %s319_s12 }
  0x26   : > { %p1136_p5 = scmp.lt.s32.totalorder %s1134_s20, %s1127_s19 }
  0x27   : > { %p1130_p0 = pnand %p1128_p13, %p1116_p8 }
  0x28   : > { %p1137_p2 = por %p1136_p5, %p1135_p4 }
  0x29   : > { %p1131_p3 = pneg %p1130_p0 }
  0x2b   : > { %p1138_p1 = pnand %p1137_p2, %p1131_p3 }
  0x2d   : > { %1141 = shalt.err (!%p1138_p1)
}
  0x2e   : > { %s1335_s21 = smov 64   ;;  %s1336_s22 = smov 4  }
  0x2f   : > { %1006 = dma.hbm_to_vmem [thread:$0]  (!%p1436_p6), %s1718_s3, 256, %s319_s12, %s1440_s13, %s1335_s21, %s1335_s21, %s1336_s22  }
  0x30   : > { %s1460_s11 = sadd.s32 4294967295, %s1332_s30   ;;  %s896_s14 = sadd.s32 4294967294, %s1332_s30  }
  0x31   : > { %p132_p1 = scmp.ne.s32.totalorder %s1320_s27, %s1316_s26  ;;  %p1710_p2 = scmp.eq.s32.totalorder %s1460_s11, 0 }
  0x32   : > { %p194_p4 = scmp.ne.s32.totalorder %s1312_s25, %s1308_s24  ;;  %p1707_p5 = scmp.eq.s32.totalorder %s1460_s11, 1 }
  0x33   : > { %p230_p7 = scmp.eq.s32.totalorder %s896_s14, 1  ;;  %p1471_p8 = por %p1710_p2, %p132_p1 }
  0x34   : > { %p1477_p6 = por %p194_p4, %p1710_p2  ;;  %p1721_p9 = scmp.ne.s32.totalorder %s1320_s27, 0 }
  0x35   : > { %s1719_s10 = scalar_select %p1471_p8, 1, 0 }
  0x36   : > { %s1720_s12 = scalar_select %p1477_p6, 1, 0 }
  0x37   : > { %p1485_p10 = por %p1721_p9, %p1707_p5  ;;  %p1489_p11 = por %p230_p7, %p132_p1 }
  0x38   : > { %p1493_p12 = por %p230_p7, %p194_p4  ;;  %p901_p13 = scmp.ge.s32.totalorder %s1332_s30, 1 }
  0x39   : > { %s1722_s15 = scalar_select %p1485_p10, 1, 0 }
  0x3a   : > { %s1723_s16 = scalar_select %p1489_p11, 1, 0 }
  0x3b   : > { %s1724_s17 = scalar_select %p1493_p12, 1, 0 }
  0x3c   : > { %p271_p0 = scmp.lt.s32.totalorder %s1332_s30, 3  ;;  %s1337_s19 = smov [#allocation3]  }
  0x3d   : > { %s286_s20 = sshll.u32 %s1337_s19, 4  ;;  %s287_s20 = int_to_ptr.vmem [resolvable:$true] %s286_s20 }
  0x3e   : > { %p1499_p3 = pnand %p901_p13, %p271_p0  ;;  %s1153_s23 = scalar_lea.vmem %s287_s20, 128 }
  0x3f   : > { %p1154_p4 = scmp.ne.s32.totalorder %s287_s20, %s1153_s23  ;;  %p1161_p12 = scmp.lt.s32.totalorder %s287_s20, %s287_s20 }
  0x40   : > { %s1725_s18 = scalar_select %p1499_p3, 1, 0 }
  0x41   : > { %p999_p9 = pneg %p1499_p3  ;;  %p1162_p10 = scmp.lt.s32.totalorder %s1153_s23, %s1153_s23 }
  0x43   : > { %p1000_p1 = pnand %p999_p9, %p1710_p2  ;;  %p1163_p6 = por %p1162_p10, %p1161_p12 }
  0x45   : > { %p1144_p5 = pneg %p1000_p1 }
  0x47   : > { %p1156_p7 = pnand %p1154_p4, %p1144_p5 }
  0x49   : > { %p1157_p11 = pneg %p1156_p7 }
  0x4b   : > { %p1164_p13 = pnand %p1163_p6, %p1157_p11 }
  0x4d   : > { %1167 = shalt.err (!%p1164_p13)
}
  0x4e   : > { %s1726_s0 = sld [smem:[#allocation18_spill]]  ;;  %p1305_p0 = scmp.ne.s32.totalorder %s1312_s25, 0 }
  0x4f   : > { %p1727_p9 = scmp.eq.s32.totalorder %s1332_s30, 0  ;;  %p1728_p4 = scmp.eq.s32.totalorder %s1460_s11, 1 }
  0x50   : > { %s1338_s23 = smov [#allocation8]   ;;  %p1730_p6 = scmp.lt.s32.totalorder %s1332_s30, 2 }
  0x51   : > { %p190_p5 = por %p1305_p0, %p1727_p9  ;;  %p1518_p7 = por %p1305_p0, %p1728_p4 }
  0x52   : > { %s351_s3 = sshll.u32 %s1338_s23, 4  ;;  %s352_s3 = int_to_ptr.vmem [resolvable:$true] %s351_s3 }
  0x53   : > { %p1007_p10 = pnand %p1730_p6, %p190_p5  ;;  %s1181_s9 = scalar_lea.vmem %s352_s3, 256 }
  0x54   : > { %1002 = dma.hbm_to_vmem [thread:$0]  (!%p1000_p1), %s1726_s0, 128, %s287_s20, [#allocation4], %s1335_s21, %s1335_s21, %s1336_s22  }
  0x55   : > { %p1170_p11 = pneg %p1007_p10  ;;  %p1182_p12 = scmp.ne.s32.totalorder %s352_s3, %s1181_s9 }
  0x56   : > { %s1188_s14 = scalar_lea.vmem %s352_s3, 512  ;;  %p1189_p1 = scmp.lt.s32.totalorder %s352_s3, %s352_s3 }
  0x57   : > { %p1184_p13 = pnand %p1182_p12, %p1170_p11  ;;  %p1190_p8 = scmp.lt.s32.totalorder %s1188_s14, %s1181_s9 }
  0x59   : > { %p1185_p2 = pneg %p1184_p13  ;;  %p1191_p3 = por %p1190_p8, %p1189_p1 }
  0x5b   : > { %p1192_p9 = pnand %p1191_p3, %p1185_p2 }
  0x5d   : > { %1195 = shalt.err (!%p1192_p9)
}
  0x5e   : > { %1009 = dma.hbm_to_vmem [thread:$0]  (!%p1007_p10), %s1701_s5, 256, %s352_s3, %s1440_s13, %s1335_s21, %s1335_s21, %s1336_s22  }
  0x5f   : > { %p1731_p0 = scmp.ne.s32.totalorder %s1725_s18, 0 }
  0x60   : > { %p1732_p5 = scmp.eq.s32.totalorder (!%p1731_p0), %s1460_s11, 0 }
  0x61   : > { %363 = sbr.rel (%p1731_p0) target bundleno = 944 (0x3b0), region = 44 }
  0x66   : > { %1285 = dma.done.wait (%p1732_p5), [#allocation4], 128   ;;  %p1733_p4 = pmov %p1732_p5 }
  0x67   : > { %s369_s9 = sand.u32 1, %s1460_s11   ;;  %s1539_s14 = sand.u32 1, %s1320_s27  }
  0x68   : > { %1287 = vsyncadd (%p1733_p4), [#allocation4], 4294967168  ;;  %s911_s0 = sshll.u32 %s1539_s14, 4  ;;  %s370_s8 = scalar_lea.sflag [#allocation7], %s369_s9 }
  0x69   : > { %s1542_s20 = scalar_lea.vmem [#allocation6], %s911_s0  ;;  %p1734_p2 = scmp.ne.s32.totalorder %s1719_s10, 0 }
  0x6b   : > { %1289 = dma.done.wait (%p1734_p2), %s370_s8, 256  }
  0x6c   : > { %1291 = vsyncadd (%p1734_p2), %s370_s8, 4294967040  ;;  %s1549_s3 = sand.u32 1, %s1312_s25   ;;  %p1735_p8 = scmp.ne.s32.totalorder %s1720_s12, 0 }
  0x6d   : > { %s912_s13 = sshll.u32 %s1549_s3, 4 }
  0x6e   : > { %s1552_s21 = scalar_lea.vmem [#allocation8], %s912_s13 }
  0x6f   : > { %1293 = dma.done.wait (%p1735_p8), %s370_s8, 256  }
  0x70   : > { %1295 = vsyncadd (%p1735_p8), %s370_s8, 4294967040  ;;  %s913_s0 = sshll.u32 %s1539_s14, 3  ;;  %s914_s22 = sshll.u32 %s1549_s3, 3 }
  0x71   : > { %p431_p3 = scmp.lt.s32.totalorder %s1324_s28, 0  ;;  %s1571_s13 = scalar_lea.vmem [#allocation9], %s913_s0 }
  0x72   : > { %s1573_s8 = scalar_lea.vmem [#allocation10], %s914_s22  ;;  %p918_p6 = scmp.ne.s32.totalorder %s1324_s28, 0 }
  0x73   : > { %s1562_s11 = scalar_select %p431_p3, %s1324_s28, 0 }
  0x74   : > { %452 = sbr.rel (%p918_p6) target bundleno = 439 (0x1b7), region = 60  ;;  %s1736_s1 = sld [smem:[#allocation19_spill]] (!%p918_p6) }
  0x75   : > { %s1565_s10 = scalar_select %p431_p3, %s1562_s11, 0 }
  0x77   : > { %s435_s9 = scalar_lea.vmem %s1700_s4, %s1565_s10 }
  0x79   : > { %v952_v0 = vld [vmem:[#allocation3] sm:$0xff]   ;;  %vm457_vm0 = vcmask 261120   ;;  %v920_v24 = vld [vmem:[%s1698_s2] ss:$0 sm:$0xff]  ;;  %vm511_vm1 = vcmask 257024  }
  0x7a   : > { %v953_v1 = vunpack.c.l.bf16 %v952_v0  ;;  %v954_v2 = vunpack.c.h.bf16 %v952_v0  ;;  %v919_v22 = vld [vmem:[%s1736_s1] ss:$0 sm:$0xff] }
  0x7c   : > { %v458_v3 = vsel %vm457_vm0, %v953_v1, 0.0  ;;  %v461_v4 = vsel %vm457_vm0, %v954_v2, 0.0 }
  0x7d   : > { %459 = vadd.xlane.f32.xlu0 %v458_v3 }
  0x81   : > { %462 = vadd.xlane.f32.xlu0 %v461_v4 }
 0x106   : > { %v460_v5 = vpop.xlane.xlu0 %459 }
 0x107   : > { %v465_v6 = vmul.f32 0.03125, %v460_v5 }
 0x109   : > { %v467_v7 = vsub.f32 %v953_v1, %v465_v6 }
 0x10a   : > { %v463_v8 = vpop.xlane.xlu0 %462 }
 0x10b   : > { %v466_v9 = vmul.f32 0.03125, %v463_v8  ;;  %v469_v10 = vmul.f32 %v467_v7, %v467_v7 }
 0x10d   : > { %v468_v11 = vsub.f32 %v954_v2, %v466_v9  ;;  %v471_v12 = vsel %vm457_vm0, %v469_v10, 0.0 }
 0x10e   : > { %472 = vadd.xlane.f32.xlu1 %v471_v12 }
 0x10f   : > { %v470_v13 = vmul.f32 %v468_v11, %v468_v11 }
 0x111   : > { %v474_v14 = vsel %vm457_vm0, %v470_v13, 0.0 }
 0x112   : > { %475 = vadd.xlane.f32.xlu1 %v474_v14 }
 0x197   : > { %v473_v15 = vpop.xlane.xlu1 %472 }
 0x198   : > { %v477_v16 = vmul.f32 0.03125, %v473_v15 }
 0x19a   : > { %v479_v17 = vadd.f32 1e-05, %v477_v16 }
 0x19b   : > { %v476_v18 = vpop.xlane.xlu1 %475 }
 0x19c   : > { %1102 = vrsqrt.f32 %v479_v17  ;;  %v478_v19 = vmul.f32 0.03125, %v476_v18 }
 0x19e   : > { %v480_v20 = vadd.f32 1e-05, %v478_v19 }
 0x1a0   : > { %1104 = vrsqrt.f32 %v480_v20 }
 0x1a9   : > { %v1103_v21 = vpop.eup %1102 }
 0x1aa   : > { %v483_v23 = vmul.f32 %v1103_v21, %v467_v7 }
 0x1ac   : > { %v492_v25 = vmul.f32 %v919_v22, %v483_v23 }
 0x1ad   : > { %v1105_v26 = vpop.eup %1104 }
 0x1ae   : > { %v501_v27 = vadd.f32 %v920_v24, %v492_v25  ;;  %v484_v28 = vmul.f32 %v1105_v26, %v468_v11 }
 0x1b0   : > { %v945_v29 = vpack.c.bf16 %v501_v27, %v501_v27  ;;  %v493_v30 = vmul.f32 %v919_v22, %v484_v28 }
 0x1b2   : > { %512 = vst.msk [vmem:[#allocation2] sm:$0xf] %vm511_vm1, %v945_v29  ;;  %v502_v31 = vadd.f32 %v920_v24, %v493_v30 }
 0x1b4   : > { %v946_v32 = vpack.c.bf16 %v502_v31, %v502_v31 }
 0x1b6   : > { %513 = vst.msk [vmem:[#allocation2 + $0x4] sm:$0xf] %vm511_vm1, %v946_v32 }
 0x1b7 PF: > { %p923_p10 = scmp.ge.s32.totalorder %s1324_s28, 1 }
 0x1b9   : > { %v514_v33 = vld [vmem:[#allocation2] sm:$0xf]  ;;  %519 = sbr.rel (%p923_p10) target bundleno = 657 (0x291), region = 64 }
 0x1bd   : > { %v515_v34 = vld [vmem:[#allocation2 + $0x4] sm:$0xf] }
 0x1be   : > { %v1106_v35 = vld [vmem:[%s1542_s20 + $0x8] sm:$0xff]   ;;  %v1339_v36 = vmov 0.0   ;;  %v1107_v37 = vld [vmem:[%s1542_s20] sm:$0xff]   ;;  %vm1340_vm2 = vmmov 0   ;;  %v925_v38 = vcombine.low %v514_v33, %v515_v34  ;;  %vm548_vm3 = vcmask 261120  }
 0x1bf   : > { %971 = vmatprep.subr.bf16.mxu0 %v1339_v36  ;;  %975 = vmatprep.mubr.msk.bf16.mxu0 %vm1340_vm2, %v1339_v36  ;;  %v924_v40 = vld [vmem:[%s435_s9] ss:$0 sm:$0xff] }
 0x1c0   : > { %972 = vmatpush3.bf16.msra.mxu0 %v1106_v35 }
 0x1c1   : > { %973 = vmatprep.subr.bf16.mxu0 %v1339_v36 }
 0x1c4   : > { %974 = vmatpush3.bf16.msra.mxu0 %v1107_v37 }
 0x1c7   : > { %976 = vmatmul.mubr.msk.bf16.vlgmr.msra.gmra.mxu0 %vm548_vm3, %v925_v38 }
 0x287   : > { %v586_v39 = vpop.f32.mrf.mxu0 }
 0x288   : > { %v587_v43 = vadd.f32 %v924_v40, %v586_v39 }
 0x289   : > { %v977_v41 = vpop.f32.mrf.mxu0 }
 0x28b   : > { %v589_v42 = vpop.f32.mrf.mxu0 }
 0x28c   : > { %v590_v44 = vadd.f32 %v924_v40, %v589_v42 }
 0x28d   : > { %v978_v45 = vpop.f32.mrf.mxu0 }
 0x28e   : > { %v958_v46 = vpack.c.bf16 %v590_v44, %v587_v43 }
 0x290   : > { %959 = vst [vmem:[%s1571_s13] sm:$0xff] %v958_v46  }
 0x291 PF: > { %p931_p11 = scmp.lt.s32.totalorder %s1324_s28, 1 }
 0x293   : > { %606 = sbr.rel (%p931_p11) target bundleno = 893 (0x37d), region = 68 }
 0x298   : > { %v1108_v47 = vld [vmem:[%s1552_s21 + $0x8] sm:$0xff]   ;;  %v1341_v48 = vmov 0.0   ;;  %v1109_v49 = vld [vmem:[%s1552_s21] sm:$0xff]   ;;  %vm1342_vm4 = vmmov 0   ;;  %v932_v50 = vcombine.low %v514_v33, %v515_v34  ;;  %vm628_vm5 = vcmask 261120  }
 0x299   : > { %979 = vmatprep.subr.bf16.mxu0 %v1341_v48  ;;  %983 = vmatprep.mubr.msk.bf16.mxu0 %vm1342_vm4, %v1341_v48 }
 0x29a   : > { %980 = vmatpush3.bf16.msra.mxu0 %v1108_v47 }
 0x29b   : > { %981 = vmatprep.subr.bf16.mxu0 %v1341_v48 }
 0x29e   : > { %982 = vmatpush3.bf16.msra.mxu0 %v1109_v49 }
 0x2a1   : > { %984 = vmatmul.mubr.msk.bf16.vlgmr.msra.gmra.mxu0 %vm628_vm5, %v932_v50 }
 0x361   : > { %v666_v51 = vpop.f32.mrf.mxu0 }
 0x362   : > { %v675_v52 = vmul.f32 0.70710677, %v666_v51  ;;  %v673_v60 = vmul.f32 0.5, %v666_v51 }
 0x363   : > { %v985_v53 = vpop.f32.mrf.mxu0 }
 0x364   : > { %1110 = verf.f32 %v675_v52 }
 0x365   : > { %v669_v54 = vpop.f32.mrf.mxu0 }
 0x366   : > { %v676_v55 = vmul.f32 0.70710677, %v669_v54  ;;  %v674_v61 = vmul.f32 0.5, %v669_v54 }
 0x367   : > { %v986_v56 = vpop.f32.mrf.mxu0 }
 0x368   : > { %1112 = verf.f32 %v676_v55 }
 0x371   : > { %v1111_v57 = vpop.eup %1110 }
 0x372   : > { %v679_v58 = vadd.f32 1.0, %v1111_v57 }
 0x374   : > { %v681_v63 = vmul.f32 %v679_v58, %v673_v60 }
 0x375   : > { %v1113_v59 = vpop.eup %1112 }
 0x376   : > { %v680_v62 = vadd.f32 1.0, %v1113_v59 }
 0x378   : > { %v682_v0 = vmul.f32 %v680_v62, %v674_v61 }
 0x37a   : > { %v963_v1 = vpack.c.bf16 %v682_v0, %v681_v63 }
 0x37c   : > { %964 = vst [vmem:[%s1573_s8] sm:$0xff] %v963_v1  }
 0x37d PF: > { %s940_s20 = sshll.u32 %s1562_s11, 6  ;;  %s715_s0 = sshll.u32 %s1571_s13, 4  ;;  %s1606_s0 = int_to_ptr.vmem [resolvable:$true] %s715_s0 }
 0x37e   : > { %s1603_s9 = scalar_lea.hbm %s1702_s6, %s940_s20  ;;  %s1196_s18 = scalar_lea.vmem %s1606_s0, 128 }
 0x37f   : > { %p1197_p12 = scmp.ne.s32.totalorder %s1606_s0, %s1196_s18  ;;  %p1737_p13 = scmp.ne.s32.totalorder %s1722_s15, 0 }
 0x380   : > { %s1343_s23 = smov [#allocation9]  }
 0x381   : > { %p1198_p1 = pnand %p1197_p12, %p1737_p13  ;;  %s1200_s12 = sshll.u32 %s1343_s23, 4  ;;  %s1201_s12 = int_to_ptr.vmem [resolvable:$false] %s1200_s12 }
 0x382   : > { %s1202_s11 = scalar_lea.vmem %s1201_s12, 256  ;;  %p1203_p0 = scmp.lt.s32.totalorder %s1606_s0, %s1201_s12 }
 0x383   : > { %p1199_p9 = pneg %p1198_p1  ;;  %p1204_p5 = scmp.lt.s32.totalorder %s1202_s11, %s1196_s18 }
 0x385   : > { %p1205_p4 = por %p1204_p5, %p1203_p0 }
 0x387   : > { %p1206_p2 = pnand %p1205_p4, %p1199_p9 }
 0x389   : > { %1209 = shalt.err (!%p1206_p2)
}
 0x38a   : > { %s1210_s13 = scalar_lea.hbm %s1603_s9, 128  ;;  %s1214_s10 = scalar_lea.hbm %s1702_s6, 128 }
 0x38b   : > { %p1211_p8 = scmp.ne.s32.totalorder %s1603_s9, %s1210_s13  ;;  %p1215_p10 = scmp.lt.s32.totalorder %s1603_s9, %s1702_s6 }
 0x38c   : > { %p1216_p11 = scmp.lt.s32.totalorder %s1214_s10, %s1210_s13 }
 0x38d   : > { %p1212_p3 = pnand %p1211_p8, %p1737_p13 }
 0x38e   : > { %p1217_p12 = por %p1216_p11, %p1215_p10 }
 0x38f   : > { %p1213_p6 = pneg %p1212_p3 }
 0x391   : > { %p1218_p1 = pnand %p1217_p12, %p1213_p6 }
 0x393   : > { %1221 = shalt.err (!%p1218_p1)
}
 0x394   : > { %s1344_s18 = smov 64   ;;  %s1345_s12 = smov 4  }
 0x395   : > { %s1738_s22 = scalar_lea.sflag [#allocation5], %s1539_s14  ;;  %s941_s11 = sadd.s32 4294967295, %s1324_s28 }
 0x396   : > { %995 = dma.vmem_to_hbm [thread:$0]  (%p1737_p13), %s1606_s0, 128, %s1603_s9, %s1738_s22, %s1344_s18, %s1344_s18, %s1345_s12  }
 0x397   : > { %p726_p9 = scmp.gt.s32.totalorder %s941_s11, 0  ;;  %s735_s13 = sshll.u32 %s1573_s8, 4  ;;  %s1636_s13 = int_to_ptr.vmem [resolvable:$true] %s735_s13 }
 0x398   : > { %s699_s15 = scalar_lea.sflag [#allocation11], %s1549_s3  ;;  %s1222_s1 = scalar_lea.vmem %s1636_s13, 128 }
 0x399   : > { %s1751_s11 = smov (!%p726_p9, %s941_s11), 0  ;;  %p1223_p0 = scmp.ne.s32.totalorder %s1636_s13, %s1222_s1 }
 0x39a   : > { %s942_s20 = sshll.u32 %s1751_s11, 6  ;;  %s1346_s28 = smov [#allocation10]  }
 0x39b   : > { %s1641_s23 = scalar_lea.hbm %s1703_s7, %s942_s20  ;;  %p1224_p13 = pnand %p1223_p0, %p1518_p7 }
 0x39c   : > { %s1226_s14 = sshll.u32 %s1346_s28, 4  ;;  %s1227_s14 = int_to_ptr.vmem [resolvable:$false] %s1226_s14 }
 0x39d   : > { %p1225_p5 = pneg %p1224_p13  ;;  %s1228_s8 = scalar_lea.vmem %s1227_s14, 256 }
 0x39e   : > { %p1229_p4 = scmp.lt.s32.totalorder %s1636_s13, %s1227_s14  ;;  %p1230_p2 = scmp.lt.s32.totalorder %s1228_s8, %s1222_s1 }
 0x3a0   : > { %p1231_p8 = por %p1230_p2, %p1229_p4 }
 0x3a2   : > { %p1232_p3 = pnand %p1231_p8, %p1225_p5 }
 0x3a4   : > { %1235 = shalt.err (!%p1232_p3)
}
 0x3a5   : > { %s1236_s9 = scalar_lea.hbm %s1641_s23, 128  ;;  %s1240_s22 = scalar_lea.hbm %s1703_s7, 128 }
 0x3a6   : > { %p1237_p6 = scmp.ne.s32.totalorder %s1641_s23, %s1236_s9  ;;  %p1241_p12 = scmp.lt.s32.totalorder %s1641_s23, %s1703_s7 }
 0x3a7   : > { %p1242_p1 = scmp.lt.s32.totalorder %s1240_s22, %s1236_s9 }
 0x3a8   : > { %p1238_p10 = pnand %p1237_p6, %p1518_p7 }
 0x3a9   : > { %p1243_p9 = por %p1242_p1, %p1241_p12 }
 0x3aa   : > { %p1239_p11 = pneg %p1238_p10 }
 0x3ac   : > { %p1244_p0 = pnand %p1243_p9, %p1239_p11 }
 0x3ae   : > { %1247 = shalt.err (!%p1244_p0)
}
 0x3af   : > { %996 = dma.vmem_to_hbm [thread:$0]  (%p1518_p7), %s1636_s13, 128, %s1641_s23, %s699_s15, %s1344_s18, %s1344_s18, %s1345_s12  }
 0x3b0 PF: > { %s750_s1 = sand.u32 1, %s1316_s26   ;;  %p1739_p13 = scmp.ne.s32.totalorder %s1723_s16, 0 }
 0x3b1   : > { %p1740_p5 = scmp.ge.s32.totalorder %s1332_s30, 2  ;;  %s751_s21 = scalar_lea.sflag [#allocation5], %s750_s1 }
 0x3b3   : > { %p1011_p4 = pnand %p1740_p5, %p1739_p13 }
 0x3b5   : > { %p1012_p2 = pneg %p1011_p4 }
 0x3b7   : > { %1297 = dma.done.wait (%p1012_p2), %s751_s21, 128  }
 0x3b8   : > { %1299 = vsyncadd (%p1012_p2), %s751_s21, 4294967168  ;;  %s759_s19 = sand.u32 1, %s1308_s24   ;;  %p1741_p8 = scmp.ne.s32.totalorder %s1724_s17, 0 }
 0x3b9   : > { %p1742_p3 = pmov %p1740_p5  ;;  %s760_s18 = scalar_lea.sflag [#allocation11], %s759_s19 }
 0x3bb   : > { %p1014_p6 = pnand %p1742_p3, %p1741_p8 }
 0x3bd   : > { %p1015_p7 = pneg %p1014_p6 }
 0x3bf   : > { %1301 = dma.done.wait (%p1015_p7), %s760_s18, 128  }
 0x3c0   : > { %1303 = vsyncadd (%p1015_p7), %s760_s18, 4294967168  ;;  %s28_s30 = sadd.s32 1, %s1332_s30   ;;  %s1743_s16 = sld [smem:[#allocation17_spill]] }
 0x3c1   : > { %p25_p10 = scmp.ge.s32.totalorder %s28_s30, 4   ;;  %s1744_s24 = smov %s1312_s25 }
 0x3c2   : > { %s1681_s25 = smov 0   ;;  %s1745_s26 = smov %s1320_s27 }
 0x3c3   : > { %s1686_s27 = smov 0   ;;  %s1746_s28 = smov %s1328_s29 }
 0x3c4   :  { %27 = sbr.rel (!%p25_p10) target bundleno = 14 (0xe), region = 138 }
 0x3c6   : > { %s1747_s29 = smov %s1743_s16 }
 0x3c9   :  { %765 = vsyncpa [#allocation4], 1 }
 0x3ca   :  { %767 = vsyncpa [#allocation4 + $0x1], 1 }
 0x3cb   :  { %768 = vsyncpa [#allocation7], 1 }
 0x3cc   :  { %770 = vsyncpa [#allocation7 + $0x1], 1 }
 0x3cd   :  { %771 = vsyncpa [#allocation5], 1 }
 0x3ce   :  { %773 = vsyncpa [#allocation5 + $0x1], 1 }
 0x3cf   :  { %774 = vsyncpa [#allocation11], 1 }
 0x3d0   :  { %776 = vsyncpa [#allocation11 + $0x1], 1 }

</bundles_post_ra>
